<compile_context>
chip_gen: v7x
topology: tpu7x:2x2x1
jax: 0.10.0
libtpu: 0.0.40
codegen_flags: <defaults>
</compile_context>

<pallas_src>
import functools

import jax
import jax.numpy as jnp
from jax import lax
from jax.experimental import pallas as pl
from jax.experimental.pallas import tpu as pltpu


# ---------------------------------------------------------------------------
# Fused kernel: one grid step == one image
# ---------------------------------------------------------------------------
def _pelee_fused_kernel(x_ref,
                        wpw_ref, bpw_ref,
                        wk12_ref, bk12_ref,
                        wk2_ref, bk2_ref,
                        out_ref,
                        pad_ref, col_ref,
                        *, W):
    """x_ref: (1, Cin, H*W) f32.
    wpw:  (2*IC, Cin) bf16      bpw:  (2*IC, 1) f32   -- both 1x1 convs stacked
    wk12: (2*Cout, 9*2*IC) bf16 bk12: (2*Cout, 1) f32 -- part1 3x3 + part2 3x3#1 fused
    wk2:  (Cout, 9*Cout) bf16   bk2:  (Cout, 1) f32   -- part2 3x3#2
    out_ref: (1, Cin + 2*Cout, H*W) f32.
    pad_ref: (Cmax, H*W + 2*(W+1)) f32; col_ref: (9*Cmax, H*W) f32."""
    f32 = jnp.float32
    bf16 = jnp.bfloat16
    HW = x_ref.shape[2]
    P = W + 1                              # zero-pad width in flat spatial coords
    cout = wk2_ref.shape[0]

    # Output column coordinate (0..W-1) on the lane axis, for dx boundary masks.
    col_idx = lax.broadcasted_iota(jnp.int32, (1, HW), 1) % W
    mask_l = col_idx >= 1                  # valid for taps with dx == -1
    mask_r = col_idx <= W - 2              # valid for taps with dx == +1

    # Zero the padded slab once; the margins provide the dy = +-1 zero rows.
    pad_ref[...] = jnp.zeros_like(pad_ref)

    def conv3x3(v, w_ref, b_ref):
        """3x3 'same' conv + bias + ReLU on v:(C, HW) f32 -> (Cout', HW) f32."""
        C = v.shape[0]
        pad_ref[0:C, P:P + HW] = v         # in-kernel zero padding
        t = 0
        for dy in (-1, 0, 1):
            for dx in (-1, 0, 1):
                s = dy * W + dx
                slab = pad_ref[0:C, P + s:P + s + HW]           # (C, HW)
                if dx == -1:
                    slab = jnp.where(mask_l, slab, 0.0)
                elif dx == 1:
                    slab = jnp.where(mask_r, slab, 0.0)
                col_ref[t * C:(t + 1) * C, :] = slab
                t += 1
        # One lane-dense MXU matmul over the whole image: (Cout', 9C) @ (9C, HW).
        xc = col_ref[0:9 * C, :].astype(bf16)
        acc = jnp.dot(w_ref[...], xc, preferred_element_type=f32)
        return jnp.maximum(acc + b_ref[...], 0.0)

    x = x_ref[0]                           # (Cin, HW) f32
    xb = x.astype(bf16)

    # ---- Both 1x1 convs in one MXU matmul: rows [0,IC) = part1, [IC,2IC) = part2.
    t12 = jnp.maximum(
        jnp.dot(wpw_ref[...], xb, preferred_element_type=f32) + bpw_ref[...],
        0.0)                               # (2*IC, HW)

    # ---- part1 3x3 and part2 first 3x3 fused: block-diagonal weights over the
    #      stacked activations -> one im2col, one matmul -> (2*Cout, HW).
    pu = conv3x3(t12, wk12_ref, bk12_ref)
    p1 = pu[0:cout, :]                     # part1 output
    u = pu[cout:2 * cout, :]               # part2 intermediate

    # ---- part2 second 3x3.
    p2 = conv3x3(u, wk2_ref, bk2_ref)

    # torch.cat((x, part1_out, part2_out), dim=1): one lane-dense block store.
    out_ref[0] = jnp.concatenate([x, p1, p2], axis=0).astype(out_ref.dtype)


# ---------------------------------------------------------------------------
# Parameter prep (BN already folded): kernel-side layouts, bf16 MXU weights
# ---------------------------------------------------------------------------
def _prep_kernel_params(params):
    (w1pw, b1pw), (w1k, b1k) = params["part1"]
    (w2pw, b2pw), (w2k1, b2k1), (w2k2, b2k2) = params["part2"]

    def pw2d(w):        # (Cout, Cin, 1, 1) -> (Cout, Cin)
        return w[:, :, 0, 0]

    def kxk2d(w):       # (Cout, Cin, 3, 3) -> (Cout, 9*Cin), tap-major / ci-minor
        co, ci, kh, kw = w.shape
        return jnp.transpose(w, (0, 2, 3, 1)).reshape(co, kh * kw * ci)

    def bias(b):        # (C,) -> (C, 1) f32 column (broadcasts over HW lanes)
        return b.reshape(-1, 1).astype(jnp.float32)

    # Stack both pointwise convs into one weight: (2*IC, Cin).
    wpw = jnp.concatenate([pw2d(w1pw), pw2d(w2pw)], axis=0).astype(jnp.bfloat16)
    bpw = jnp.concatenate([bias(b1pw), bias(b2pw)], axis=0)

    # Fuse part1.convkxk and part2.conv1kxk: block-diagonal over the stacked
    # 2*IC input channels (part1 reads [0,IC), part2 reads [IC,2IC)).
    z1 = jnp.zeros_like(w1k)
    z2 = jnp.zeros_like(w2k1)
    wk12_oihw = jnp.concatenate(
        [jnp.concatenate([w1k, z1], axis=1),
         jnp.concatenate([z2, w2k1], axis=1)],
        axis=0)                                     # (2*Cout, 2*IC, 3, 3)
    wk12 = kxk2d(wk12_oihw).astype(jnp.bfloat16)
    bk12 = jnp.concatenate([bias(b1k), bias(b2k1)], axis=0)

    wk2 = kxk2d(w2k2).astype(jnp.bfloat16)
    bk2 = bias(b2k2)

    return wpw, bpw, wk12, bk12, wk2, bk2


# ---------------------------------------------------------------------------
# PeleeUnit forward (NCHW in, NCHW out, one pallas_call)
# ---------------------------------------------------------------------------
def pelee_unit_forward(x_nchw, params):
    N, Cin, H, W = x_nchw.shape
    HW = H * W

    wpw, bpw, wk12, bk12, wk2, bk2 = _prep_kernel_params(params)
    wb = [wpw, bpw, wk12, bk12, wk2, bk2]

    IC2 = wpw.shape[0]                     # 2 * internal_channel
    Cout = wk2.shape[0]
    Ctot = Cin + 2 * Cout
    Cmax = max(IC2, Cout)

    # (N, C, H, W) -> (N, C, H*W): contiguous trailing-dim collapse (no transpose).
    x2 = x_nchw.reshape(N, Cin, HW)

    const2 = lambda n: (0, 0)
    kern = functools.partial(_pelee_fused_kernel, W=W)

    out = pl.pallas_call(
        kern,
        out_shape=jax.ShapeDtypeStruct((N, Ctot, HW), x_nchw.dtype),
        grid_spec=pltpu.PrefetchScalarGridSpec(
            num_scalar_prefetch=0,
            grid=(N,),
            in_specs=[pl.BlockSpec((1, Cin, HW), lambda n: (n, 0, 0))]
                     + [pl.BlockSpec(a.shape, const2) for a in wb],
            out_specs=pl.BlockSpec((1, Ctot, HW), lambda n: (n, 0, 0)),
            scratch_shapes=[
                pltpu.VMEM((Cmax, HW + 2 * (W + 1)), jnp.float32),  # padded slab
                pltpu.VMEM((9 * Cmax, HW), jnp.float32),            # im2col
            ],
        ),
        compiler_params=pltpu.CompilerParams(
            dimension_semantics=("parallel",)),    # 2 images -> 2 TCs on v7x
    )(x2, *wb)
    return out.reshape(N, Ctot, H, W)


# ---------------------------------------------------------------------------
# Synthetic Conv+BN params with BN folded into the conv (inference form)
# ---------------------------------------------------------------------------
def fold_conv_bn(key, cin, cout, ksize, eps=1e-5):
    """Returns folded (w_oihw, b): w: (cout, cin, k, k) f32, b: (cout,) f32."""
    k_w, k_g, k_b, k_m, k_v = jax.random.split(key, 5)
    w = jax.random.normal(k_w, (cout, cin, ksize, ksize), jnp.float32) * 0.1
    gamma = 1.0 + 0.1 * jax.random.normal(k_g, (cout,), jnp.float32)
    beta = 0.1 * jax.random.normal(k_b, (cout,), jnp.float32)
    mean = 0.1 * jax.random.normal(k_m, (cout,), jnp.float32)
    var = jnp.abs(jax.random.normal(k_v, (cout,), jnp.float32)) + 0.5

    scale = gamma / jnp.sqrt(var + eps)
    return w * scale[:, None, None, None], beta - mean * scale


# ---------------------------------------------------------------------------
# Pure-JAX f32 reference (same folded-BN math) for correctness check
# ---------------------------------------------------------------------------
def _ref_conv_bn_relu(x_nchw, w_oihw, b, padding):
    w_hwio = jnp.transpose(w_oihw, (2, 3, 1, 0))
    y = lax.conv_general_dilated(
        x_nchw, w_hwio, window_strides=(1, 1), padding=padding,
        dimension_numbers=("NCHW", "HWIO", "NCHW"))
    return jnp.maximum(y + b.reshape(1, -1, 1, 1), 0.0)


def pelee_unit_reference(x_nchw, params):
    (w1pw, b1pw), (w1k, b1k) = params["part1"]
    (w2pw, b2pw), (w2k1, b2k1), (w2k2, b2k2) = params["part2"]
    same = ((1, 1), (1, 1))
    r1 = _ref_conv_bn_relu(x_nchw, w1pw, b1pw, "VALID")
    r1 = _ref_conv_bn_relu(r1, w1k, b1k, same)
    r2 = _ref_conv_bn_relu(x_nchw, w2pw, b2pw, "VALID")
    r2 = _ref_conv_bn_relu(r2, w2k1, b2k1, same)
    r2 = _ref_conv_bn_relu(r2, w2k2, b2k2, same)
    return jnp.concatenate([x_nchw, r1, r2], axis=1)


# ---------------------------------------------------------------------------
if __name__ == "__main__":
    key = jax.random.PRNGKey(0)
    N, Cin, H, W = 2, 4, 16, 16
    Cout = 4
    internal_expansion = 2
    IC = Cout * internal_expansion          # internal_channel

    kx, k1, k2, k3, k4, k5 = jax.random.split(key, 6)
    x = jax.random.normal(kx, (N, Cin, H, W), jnp.float32)

    params = {
        "part1": (fold_conv_bn(k1, Cin, IC, 1),      # pw
                  fold_conv_bn(k2, IC, Cout, 3)),    # convkxk
        "part2": (fold_conv_bn(k3, Cin, IC, 1),      # pw
                  fold_conv_bn(k4, IC, Cout, 3),     # conv1kxk
                  fold_conv_bn(k5, Cout, Cout, 3)),  # conv2kxk
    }

    forward = jax.jit(pelee_unit_forward)
    out = jax.block_until_ready(forward(x, params))

    assert out.shape == (N, Cin + 2 * Cout, H, W), out.shape

    ref = pelee_unit_reference(x, params)
    max_err = float(jnp.max(jnp.abs(out - ref)))
    # bf16 MXU inputs with f32 accumulation -> slightly looser tolerance.
    assert jnp.allclose(out, ref, atol=3e-2, rtol=3e-2), max_err

    print("KERNEL_OK")
</pallas_src>

<mosaic_0001>
module attributes {stable_mosaic.version = 11 : i64} {
  func.func @_pelee_fused_kernel(%arg0: i32, %arg1: memref<1x4x256xf32, #tpu.memory_space<vmem>>, %arg2: memref<16x4xbf16, #tpu.memory_space<vmem>>, %arg3: memref<16x1xf32, #tpu.memory_space<vmem>>, %arg4: memref<8x144xbf16, #tpu.memory_space<vmem>>, %arg5: memref<8x1xf32, #tpu.memory_space<vmem>>, %arg6: memref<4x36xbf16, #tpu.memory_space<vmem>>, %arg7: memref<4x1xf32, #tpu.memory_space<vmem>>, %arg8: memref<1x12x256xf32, #tpu.memory_space<vmem>>, %arg9: memref<16x290xf32, #tpu.memory_space<vmem>>, %arg10: memref<144x256xf32, #tpu.memory_space<vmem>>) attributes {dimension_semantics = [#tpu.dimension_semantics<parallel>], iteration_bounds = array<i64: 2>, scalar_prefetch = 0 : i64, scratch_operands = 2 : i64, tpu.core_type = #tpu.core_type<tc>, window_params = [{transform_indices = @transform_0, window_bounds = array<i64: 1, 4, 256>}, {pipeline_mode = #tpu.pipeline_mode<synchronous>, transform_indices = @transform_1, window_bounds = array<i64: 16, 4>}, {pipeline_mode = #tpu.pipeline_mode<synchronous>, transform_indices = @transform_2, window_bounds = array<i64: 16, 1>}, {pipeline_mode = #tpu.pipeline_mode<synchronous>, transform_indices = @transform_3, window_bounds = array<i64: 8, 144>}, {pipeline_mode = #tpu.pipeline_mode<synchronous>, transform_indices = @transform_4, window_bounds = array<i64: 8, 1>}, {pipeline_mode = #tpu.pipeline_mode<synchronous>, transform_indices = @transform_5, window_bounds = array<i64: 4, 36>}, {pipeline_mode = #tpu.pipeline_mode<synchronous>, transform_indices = @transform_6, window_bounds = array<i64: 4, 1>}, {transform_indices = @transform_7, window_bounds = array<i64: 1, 12, 256>}]} {
    %0 = tpu.iota {dimensions = array<i32: 1>} : vector<1x256xi32>
    %c16_i32 = arith.constant 16 : i32
    %c0_i32 = arith.constant 0 : i32
    %1 = arith.cmpi eq, %c16_i32, %c0_i32 : i32
    %c1_i32 = arith.constant 1 : i32
    %2 = arith.select %1, %c1_i32, %c16_i32 : i32
    %3 = vector.broadcast %2 : i32 to vector<1x256xi32>
    %4 = arith.remsi %0, %3 : vector<1x256xi32>
    %c0_i32_0 = arith.constant 0 : i32
    %5 = vector.broadcast %c0_i32_0 : i32 to vector<1x256xi32>
    %6 = arith.cmpi ne, %4, %5 : vector<1x256xi32>
    %c0_i32_1 = arith.constant 0 : i32
    %7 = vector.broadcast %c0_i32_1 : i32 to vector<1x256xi32>
    %8 = arith.cmpi slt, %4, %7 : vector<1x256xi32>
    %c0_i32_2 = arith.constant 0 : i32
    %9 = arith.cmpi slt, %2, %c0_i32_2 : i32
    %10 = vector.broadcast %9 : i1 to vector<1x256xi1>
    %11 = vector.broadcast %10 : vector<1x256xi1> to vector<1x256xi1>
    %12 = arith.xori %8, %11 : vector<1x256xi1>
    %13 = arith.andi %12, %6 : vector<1x256xi1>
    %14 = vector.broadcast %2 : i32 to vector<1x256xi32>
    %15 = arith.addi %4, %14 : vector<1x256xi32>
    %16 = arith.select %13, %15, %4 : vector<1x256xi1>, vector<1x256xi32>
    %c1_i32_3 = arith.constant 1 : i32
    %17 = vector.broadcast %c1_i32_3 : i32 to vector<1x256xi32>
    %18 = arith.cmpi sge, %16, %17 : vector<1x256xi32>
    %c14_i32 = arith.constant 14 : i32
    %19 = vector.broadcast %c14_i32 : i32 to vector<1x256xi32>
    %20 = arith.cmpi sle, %16, %19 : vector<1x256xi32>
    %cst = arith.constant 0.000000e+00 : f32
    %21 = vector.broadcast %cst : f32 to vector<16x290xf32>
    %c0 = arith.constant 0 : index
    %c0_4 = arith.constant 0 : index
    %22 = vector.load %arg9[%c0, %c0_4] : memref<16x290xf32, #tpu.memory_space<vmem>>, vector<16x290xf32>
    tpu.vector_store %arg9[%c0, %c0_4], %21 {strides = array<i32>} : memref<16x290xf32, #tpu.memory_space<vmem>>, vector<16x290xf32>,
    %c0_5 = arith.constant 0 : index
    %c0_6 = arith.constant 0 : index
    %c0_7 = arith.constant 0 : index
    %23 = vector.load %arg1[%c0_5, %c0_6, %c0_7] : memref<1x4x256xf32, #tpu.memory_space<vmem>>, vector<1x4x256xf32>
    %24 = vector.shape_cast %23 : vector<1x4x256xf32> to vector<4x256xf32>
    %25 = arith.truncf %24 : vector<4x256xf32> to vector<4x256xbf16>
    %c0_8 = arith.constant 0 : index
    %c0_9 = arith.constant 0 : index
    %26 = vector.load %arg2[%c0_8, %c0_9] : memref<16x4xbf16, #tpu.memory_space<vmem>>, vector<16x4xbf16>
    %cst_10 = arith.constant dense<0.000000e+00> : vector<16x256xf32>
    %27 = tpu.matmul %26, %25, %cst_10 {dimension_numbers = #tpu.dot_dimension_numbers<[1], [0], [0], [1], [0, 0, 1, 1], [], []>} : vector<16x4xbf16>, vector<4x256xbf16>, vector<16x256xf32> -> vector<16x256xf32>
    %c0_11 = arith.constant 0 : index
    %c0_12 = arith.constant 0 : index
    %28 = vector.load %arg3[%c0_11, %c0_12] : memref<16x1xf32, #tpu.memory_space<vmem>>, vector<16x1xf32>
    %29 = vector.broadcast %28 : vector<16x1xf32> to vector<16x256xf32>
    %30 = arith.addf %27, %29 : vector<16x256xf32>
    %cst_13 = arith.constant 0.000000e+00 : f32
    %31 = vector.broadcast %cst_13 : f32 to vector<16x256xf32>
    %32 = arith.maximumf %30, %31 : vector<16x256xf32>
    %c0_14 = arith.constant 0 : index
    %c17 = arith.constant 17 : index
    %33 = vector.load %arg9[%c0_14, %c17] : memref<16x290xf32, #tpu.memory_space<vmem>>, vector<16x256xf32>
    tpu.vector_store %arg9[%c0_14, %c17], %32 {strides = array<i32>} : memref<16x290xf32, #tpu.memory_space<vmem>>, vector<16x256xf32>,
    %c0_15 = arith.constant 0 : index
    %c0_16 = arith.constant 0 : index
    %34 = vector.load %arg9[%c0_15, %c0_16] : memref<16x290xf32, #tpu.memory_space<vmem>>, vector<16x256xf32>
    %cst_17 = arith.constant 0.000000e+00 : f32
    %35 = vector.shape_cast %18 : vector<1x256xi1> to vector<1x256xi1>
    %36 = vector.broadcast %35 : vector<1x256xi1> to vector<16x256xi1>
    %37 = vector.broadcast %cst_17 : f32 to vector<16x256xf32>
    %38 = arith.select %36, %34, %37 : vector<16x256xi1>, vector<16x256xf32>
    %c0_18 = arith.constant 0 : index
    %c0_19 = arith.constant 0 : index
    %39 = vector.load %arg10[%c0_18, %c0_19] : memref<144x256xf32, #tpu.memory_space<vmem>>, vector<16x256xf32>
    tpu.vector_store %arg10[%c0_18, %c0_19], %38 {strides = array<i32>} : memref<144x256xf32, #tpu.memory_space<vmem>>, vector<16x256xf32>,
    %c0_20 = arith.constant 0 : index
    %c1 = arith.constant 1 : index
    %40 = vector.load %arg9[%c0_20, %c1] : memref<16x290xf32, #tpu.memory_space<vmem>>, vector<16x256xf32>
    %c16 = arith.constant 16 : index
    %c0_21 = arith.constant 0 : index
    %41 = vector.load %arg10[%c16, %c0_21] : memref<144x256xf32, #tpu.memory_space<vmem>>, vector<16x256xf32>
    tpu.vector_store %arg10[%c16, %c0_21], %40 {strides = array<i32>} : memref<144x256xf32, #tpu.memory_space<vmem>>, vector<16x256xf32>,
    %c0_22 = arith.constant 0 : index
    %c2 = arith.constant 2 : index
    %42 = vector.load %arg9[%c0_22, %c2] : memref<16x290xf32, #tpu.memory_space<vmem>>, vector<16x256xf32>
    %cst_23 = arith.constant 0.000000e+00 : f32
    %43 = vector.shape_cast %20 : vector<1x256xi1> to vector<1x256xi1>
    %44 = vector.broadcast %43 : vector<1x256xi1> to vector<16x256xi1>
    %45 = vector.broadcast %cst_23 : f32 to vector<16x256xf32>
    %46 = arith.select %44, %42, %45 : vector<16x256xi1>, vector<16x256xf32>
    %c32 = arith.constant 32 : index
    %c0_24 = arith.constant 0 : index
    %47 = vector.load %arg10[%c32, %c0_24] : memref<144x256xf32, #tpu.memory_space<vmem>>, vector<16x256xf32>
    tpu.vector_store %arg10[%c32, %c0_24], %46 {strides = array<i32>} : memref<144x256xf32, #tpu.memory_space<vmem>>, vector<16x256xf32>,
    %c0_25 = arith.constant 0 : index
    %c16_26 = arith.constant 16 : index
    %48 = vector.load %arg9[%c0_25, %c16_26] : memref<16x290xf32, #tpu.memory_space<vmem>>, vector<16x256xf32>
    %cst_27 = arith.constant 0.000000e+00 : f32
    %49 = vector.shape_cast %18 : vector<1x256xi1> to vector<1x256xi1>
    %50 = vector.broadcast %49 : vector<1x256xi1> to vector<16x256xi1>
    %51 = vector.broadcast %cst_27 : f32 to vector<16x256xf32>
    %52 = arith.select %50, %48, %51 : vector<16x256xi1>, vector<16x256xf32>
    %c48 = arith.constant 48 : index
    %c0_28 = arith.constant 0 : index
    %53 = vector.load %arg10[%c48, %c0_28] : memref<144x256xf32, #tpu.memory_space<vmem>>, vector<16x256xf32>
    tpu.vector_store %arg10[%c48, %c0_28], %52 {strides = array<i32>} : memref<144x256xf32, #tpu.memory_space<vmem>>, vector<16x256xf32>,
    %c0_29 = arith.constant 0 : index
    %c17_30 = arith.constant 17 : index
    %54 = vector.load %arg9[%c0_29, %c17_30] : memref<16x290xf32, #tpu.memory_space<vmem>>, vector<16x256xf32>
    %c64 = arith.constant 64 : index
    %c0_31 = arith.constant 0 : index
    %55 = vector.load %arg10[%c64, %c0_31] : memref<144x256xf32, #tpu.memory_space<vmem>>, vector<16x256xf32>
    tpu.vector_store %arg10[%c64, %c0_31], %54 {strides = array<i32>} : memref<144x256xf32, #tpu.memory_space<vmem>>, vector<16x256xf32>,
    %c0_32 = arith.constant 0 : index
    %c18 = arith.constant 18 : index
    %56 = vector.load %arg9[%c0_32, %c18] : memref<16x290xf32, #tpu.memory_space<vmem>>, vector<16x256xf32>
    %cst_33 = arith.constant 0.000000e+00 : f32
    %57 = vector.shape_cast %20 : vector<1x256xi1> to vector<1x256xi1>
    %58 = vector.broadcast %57 : vector<1x256xi1> to vector<16x256xi1>
    %59 = vector.broadcast %cst_33 : f32 to vector<16x256xf32>
    %60 = arith.select %58, %56, %59 : vector<16x256xi1>, vector<16x256xf32>
    %c80 = arith.constant 80 : index
    %c0_34 = arith.constant 0 : index
    %61 = vector.load %arg10[%c80, %c0_34] : memref<144x256xf32, #tpu.memory_space<vmem>>, vector<16x256xf32>
    tpu.vector_store %arg10[%c80, %c0_34], %60 {strides = array<i32>} : memref<144x256xf32, #tpu.memory_space<vmem>>, vector<16x256xf32>,
    %c0_35 = arith.constant 0 : index
    %c32_36 = arith.constant 32 : index
    %62 = vector.load %arg9[%c0_35, %c32_36] : memref<16x290xf32, #tpu.memory_space<vmem>>, vector<16x256xf32>
    %cst_37 = arith.constant 0.000000e+00 : f32
    %63 = vector.shape_cast %18 : vector<1x256xi1> to vector<1x256xi1>
    %64 = vector.broadcast %63 : vector<1x256xi1> to vector<16x256xi1>
    %65 = vector.broadcast %cst_37 : f32 to vector<16x256xf32>
    %66 = arith.select %64, %62, %65 : vector<16x256xi1>, vector<16x256xf32>
    %c96 = arith.constant 96 : index
    %c0_38 = arith.constant 0 : index
    %67 = vector.load %arg10[%c96, %c0_38] : memref<144x256xf32, #tpu.memory_space<vmem>>, vector<16x256xf32>
    tpu.vector_store %arg10[%c96, %c0_38], %66 {strides = array<i32>} : memref<144x256xf32, #tpu.memory_space<vmem>>, vector<16x256xf32>,
    %c0_39 = arith.constant 0 : index
    %c33 = arith.constant 33 : index
    %68 = vector.load %arg9[%c0_39, %c33] : memref<16x290xf32, #tpu.memory_space<vmem>>, vector<16x256xf32>
    %c112 = arith.constant 112 : index
    %c0_40 = arith.constant 0 : index
    %69 = vector.load %arg10[%c112, %c0_40] : memref<144x256xf32, #tpu.memory_space<vmem>>, vector<16x256xf32>
    tpu.vector_store %arg10[%c112, %c0_40], %68 {strides = array<i32>} : memref<144x256xf32, #tpu.memory_space<vmem>>, vector<16x256xf32>,
    %c0_41 = arith.constant 0 : index
    %c34 = arith.constant 34 : index
    %70 = vector.load %arg9[%c0_41, %c34] : memref<16x290xf32, #tpu.memory_space<vmem>>, vector<16x256xf32>
    %cst_42 = arith.constant 0.000000e+00 : f32
    %71 = vector.shape_cast %20 : vector<1x256xi1> to vector<1x256xi1>
    %72 = vector.broadcast %71 : vector<1x256xi1> to vector<16x256xi1>
    %73 = vector.broadcast %cst_42 : f32 to vector<16x256xf32>
    %74 = arith.select %72, %70, %73 : vector<16x256xi1>, vector<16x256xf32>
    %c128 = arith.constant 128 : index
    %c0_43 = arith.constant 0 : index
    %75 = vector.load %arg10[%c128, %c0_43] : memref<144x256xf32, #tpu.memory_space<vmem>>, vector<16x256xf32>
    tpu.vector_store %arg10[%c128, %c0_43], %74 {strides = array<i32>} : memref<144x256xf32, #tpu.memory_space<vmem>>, vector<16x256xf32>,
    %c0_44 = arith.constant 0 : index
    %c0_45 = arith.constant 0 : index
    %76 = vector.load %arg10[%c0_44, %c0_45] : memref<144x256xf32, #tpu.memory_space<vmem>>, vector<144x256xf32>
    %77 = arith.truncf %76 : vector<144x256xf32> to vector<144x256xbf16>
    %c0_46 = arith.constant 0 : index
    %c0_47 = arith.constant 0 : index
    %78 = vector.load %arg4[%c0_46, %c0_47] : memref<8x144xbf16, #tpu.memory_space<vmem>>, vector<8x144xbf16>
    %cst_48 = arith.constant dense<0.000000e+00> : vector<8x256xf32>
    %79 = tpu.matmul %78, %77, %cst_48 {dimension_numbers = #tpu.dot_dimension_numbers<[1], [0], [0], [1], [0, 0, 1, 1], [], []>} : vector<8x144xbf16>, vector<144x256xbf16>, vector<8x256xf32> -> vector<8x256xf32>
    %c0_49 = arith.constant 0 : index
    %c0_50 = arith.constant 0 : index
    %80 = vector.load %arg5[%c0_49, %c0_50] : memref<8x1xf32, #tpu.memory_space<vmem>>, vector<8x1xf32>
    %81 = vector.broadcast %80 : vector<8x1xf32> to vector<8x256xf32>
    %82 = arith.addf %79, %81 : vector<8x256xf32>
    %cst_51 = arith.constant 0.000000e+00 : f32
    %83 = vector.broadcast %cst_51 : f32 to vector<8x256xf32>
    %84 = arith.maximumf %82, %83 : vector<8x256xf32>
    %85 = vector.extract_strided_slice %84 {offsets = [0, 0], sizes = [4, 256], strides = [1, 1]} : vector<8x256xf32> to vector<4x256xf32>
    %86 = vector.extract_strided_slice %84 {offsets = [4, 0], sizes = [4, 256], strides = [1, 1]} : vector<8x256xf32> to vector<4x256xf32>
    %c0_52 = arith.constant 0 : index
    %c17_53 = arith.constant 17 : index
    %87 = vector.load %arg9[%c0_52, %c17_53] : memref<16x290xf32, #tpu.memory_space<vmem>>, vector<4x256xf32>
    tpu.vector_store %arg9[%c0_52, %c17_53], %86 {strides = array<i32>} : memref<16x290xf32, #tpu.memory_space<vmem>>, vector<4x256xf32>,
    %c0_54 = arith.constant 0 : index
    %c0_55 = arith.constant 0 : index
    %88 = vector.load %arg9[%c0_54, %c0_55] : memref<16x290xf32, #tpu.memory_space<vmem>>, vector<4x256xf32>
    %cst_56 = arith.constant 0.000000e+00 : f32
    %89 = vector.shape_cast %18 : vector<1x256xi1> to vector<1x256xi1>
    %90 = vector.broadcast %89 : vector<1x256xi1> to vector<4x256xi1>
    %91 = vector.broadcast %cst_56 : f32 to vector<4x256xf32>
    %92 = arith.select %90, %88, %91 : vector<4x256xi1>, vector<4x256xf32>
    %c0_57 = arith.constant 0 : index
    %c0_58 = arith.constant 0 : index
    %93 = vector.load %arg10[%c0_57, %c0_58] : memref<144x256xf32, #tpu.memory_space<vmem>>, vector<4x256xf32>
    tpu.vector_store %arg10[%c0_57, %c0_58], %92 {strides = array<i32>} : memref<144x256xf32, #tpu.memory_space<vmem>>, vector<4x256xf32>,
    %c0_59 = arith.constant 0 : index
    %c1_60 = arith.constant 1 : index
    %94 = vector.load %arg9[%c0_59, %c1_60] : memref<16x290xf32, #tpu.memory_space<vmem>>, vector<4x256xf32>
    %c4 = arith.constant 4 : index
    %c0_61 = arith.constant 0 : index
    %95 = vector.load %arg10[%c4, %c0_61] : memref<144x256xf32, #tpu.memory_space<vmem>>, vector<4x256xf32>
    tpu.vector_store %arg10[%c4, %c0_61], %94 {strides = array<i32>} : memref<144x256xf32, #tpu.memory_space<vmem>>, vector<4x256xf32>,
    %c0_62 = arith.constant 0 : index
    %c2_63 = arith.constant 2 : index
    %96 = vector.load %arg9[%c0_62, %c2_63] : memref<16x290xf32, #tpu.memory_space<vmem>>, vector<4x256xf32>
    %cst_64 = arith.constant 0.000000e+00 : f32
    %97 = vector.shape_cast %20 : vector<1x256xi1> to vector<1x256xi1>
    %98 = vector.broadcast %97 : vector<1x256xi1> to vector<4x256xi1>
    %99 = vector.broadcast %cst_64 : f32 to vector<4x256xf32>
    %100 = arith.select %98, %96, %99 : vector<4x256xi1>, vector<4x256xf32>
    %c8 = arith.constant 8 : index
    %c0_65 = arith.constant 0 : index
    %101 = vector.load %arg10[%c8, %c0_65] : memref<144x256xf32, #tpu.memory_space<vmem>>, vector<4x256xf32>
    tpu.vector_store %arg10[%c8, %c0_65], %100 {strides = array<i32>} : memref<144x256xf32, #tpu.memory_space<vmem>>, vector<4x256xf32>,
    %c0_66 = arith.constant 0 : index
    %c16_67 = arith.constant 16 : index
    %102 = vector.load %arg9[%c0_66, %c16_67] : memref<16x290xf32, #tpu.memory_space<vmem>>, vector<4x256xf32>
    %cst_68 = arith.constant 0.000000e+00 : f32
    %103 = vector.shape_cast %18 : vector<1x256xi1> to vector<1x256xi1>
    %104 = vector.broadcast %103 : vector<1x256xi1> to vector<4x256xi1>
    %105 = vector.broadcast %cst_68 : f32 to vector<4x256xf32>
    %106 = arith.select %104, %102, %105 : vector<4x256xi1>, vector<4x256xf32>
    %c12 = arith.constant 12 : index
    %c0_69 = arith.constant 0 : index
    %107 = vector.load %arg10[%c12, %c0_69] : memref<144x256xf32, #tpu.memory_space<vmem>>, vector<4x256xf32>
    tpu.vector_store %arg10[%c12, %c0_69], %106 {strides = array<i32>} : memref<144x256xf32, #tpu.memory_space<vmem>>, vector<4x256xf32>,
    %c0_70 = arith.constant 0 : index
    %c17_71 = arith.constant 17 : index
    %108 = vector.load %arg9[%c0_70, %c17_71] : memref<16x290xf32, #tpu.memory_space<vmem>>, vector<4x256xf32>
    %c16_72 = arith.constant 16 : index
    %c0_73 = arith.constant 0 : index
    %109 = vector.load %arg10[%c16_72, %c0_73] : memref<144x256xf32, #tpu.memory_space<vmem>>, vector<4x256xf32>
    tpu.vector_store %arg10[%c16_72, %c0_73], %108 {strides = array<i32>} : memref<144x256xf32, #tpu.memory_space<vmem>>, vector<4x256xf32>,
    %c0_74 = arith.constant 0 : index
    %c18_75 = arith.constant 18 : index
    %110 = vector.load %arg9[%c0_74, %c18_75] : memref<16x290xf32, #tpu.memory_space<vmem>>, vector<4x256xf32>
    %cst_76 = arith.constant 0.000000e+00 : f32
    %111 = vector.shape_cast %20 : vector<1x256xi1> to vector<1x256xi1>
    %112 = vector.broadcast %111 : vector<1x256xi1> to vector<4x256xi1>
    %113 = vector.broadcast %cst_76 : f32 to vector<4x256xf32>
    %114 = arith.select %112, %110, %113 : vector<4x256xi1>, vector<4x256xf32>
    %c20 = arith.constant 20 : index
    %c0_77 = arith.constant 0 : index
    %115 = vector.load %arg10[%c20, %c0_77] : memref<144x256xf32, #tpu.memory_space<vmem>>, vector<4x256xf32>
    tpu.vector_store %arg10[%c20, %c0_77], %114 {strides = array<i32>} : memref<144x256xf32, #tpu.memory_space<vmem>>, vector<4x256xf32>,
    %c0_78 = arith.constant 0 : index
    %c32_79 = arith.constant 32 : index
    %116 = vector.load %arg9[%c0_78, %c32_79] : memref<16x290xf32, #tpu.memory_space<vmem>>, vector<4x256xf32>
    %cst_80 = arith.constant 0.000000e+00 : f32
    %117 = vector.shape_cast %18 : vector<1x256xi1> to vector<1x256xi1>
    %118 = vector.broadcast %117 : vector<1x256xi1> to vector<4x256xi1>
    %119 = vector.broadcast %cst_80 : f32 to vector<4x256xf32>
    %120 = arith.select %118, %116, %119 : vector<4x256xi1>, vector<4x256xf32>
    %c24 = arith.constant 24 : index
    %c0_81 = arith.constant 0 : index
    %121 = vector.load %arg10[%c24, %c0_81] : memref<144x256xf32, #tpu.memory_space<vmem>>, vector<4x256xf32>
    tpu.vector_store %arg10[%c24, %c0_81], %120 {strides = array<i32>} : memref<144x256xf32, #tpu.memory_space<vmem>>, vector<4x256xf32>,
    %c0_82 = arith.constant 0 : index
    %c33_83 = arith.constant 33 : index
    %122 = vector.load %arg9[%c0_82, %c33_83] : memref<16x290xf32, #tpu.memory_space<vmem>>, vector<4x256xf32>
    %c28 = arith.constant 28 : index
    %c0_84 = arith.constant 0 : index
    %123 = vector.load %arg10[%c28, %c0_84] : memref<144x256xf32, #tpu.memory_space<vmem>>, vector<4x256xf32>
    tpu.vector_store %arg10[%c28, %c0_84], %122 {strides = array<i32>} : memref<144x256xf32, #tpu.memory_space<vmem>>, vector<4x256xf32>,
    %c0_85 = arith.constant 0 : index
    %c34_86 = arith.constant 34 : index
    %124 = vector.load %arg9[%c0_85, %c34_86] : memref<16x290xf32, #tpu.memory_space<vmem>>, vector<4x256xf32>
    %cst_87 = arith.constant 0.000000e+00 : f32
    %125 = vector.shape_cast %20 : vector<1x256xi1> to vector<1x256xi1>
    %126 = vector.broadcast %125 : vector<1x256xi1> to vector<4x256xi1>
    %127 = vector.broadcast %cst_87 : f32 to vector<4x256xf32>
    %128 = arith.select %126, %124, %127 : vector<4x256xi1>, vector<4x256xf32>
    %c32_88 = arith.constant 32 : index
    %c0_89 = arith.constant 0 : index
    %129 = vector.load %arg10[%c32_88, %c0_89] : memref<144x256xf32, #tpu.memory_space<vmem>>, vector<4x256xf32>
    tpu.vector_store %arg10[%c32_88, %c0_89], %128 {strides = array<i32>} : memref<144x256xf32, #tpu.memory_space<vmem>>, vector<4x256xf32>,
    %c0_90 = arith.constant 0 : index
    %c0_91 = arith.constant 0 : index
    %130 = vector.load %arg10[%c0_90, %c0_91] : memref<144x256xf32, #tpu.memory_space<vmem>>, vector<36x256xf32>
    %131 = arith.truncf %130 : vector<36x256xf32> to vector<36x256xbf16>
    %c0_92 = arith.constant 0 : index
    %c0_93 = arith.constant 0 : index
    %132 = vector.load %arg6[%c0_92, %c0_93] : memref<4x36xbf16, #tpu.memory_space<vmem>>, vector<4x36xbf16>
    %cst_94 = arith.constant dense<0.000000e+00> : vector<4x256xf32>
    %133 = tpu.matmul %132, %131, %cst_94 {dimension_numbers = #tpu.dot_dimension_numbers<[1], [0], [0], [1], [0, 0, 1, 1], [], []>} : vector<4x36xbf16>, vector<36x256xbf16>, vector<4x256xf32> -> vector<4x256xf32>
    %c0_95 = arith.constant 0 : index
    %c0_96 = arith.constant 0 : index
    %134 = vector.load %arg7[%c0_95, %c0_96] : memref<4x1xf32, #tpu.memory_space<vmem>>, vector<4x1xf32>
    %135 = vector.broadcast %134 : vector<4x1xf32> to vector<4x256xf32>
    %136 = arith.addf %133, %135 : vector<4x256xf32>
    %cst_97 = arith.constant 0.000000e+00 : f32
    %137 = vector.broadcast %cst_97 : f32 to vector<4x256xf32>
    %138 = arith.maximumf %136, %137 : vector<4x256xf32>
    %139 = tpu.concatenate %24, %85, %138 in 0 : vector<4x256xf32>, vector<4x256xf32>, vector<4x256xf32> -> vector<12x256xf32>
    %c0_98 = arith.constant 0 : index
    %c0_99 = arith.constant 0 : index
    %c0_100 = arith.constant 0 : index
    %140 = vector.load %arg8[%c0_98, %c0_99, %c0_100] : memref<1x12x256xf32, #tpu.memory_space<vmem>>, vector<1x12x256xf32>
    %141 = vector.shape_cast %140 : vector<1x12x256xf32> to vector<12x256xf32>
    %142 = vector.shape_cast %139 : vector<12x256xf32> to vector<1x12x256xf32>
    tpu.vector_store %arg8[%c0_98, %c0_99, %c0_100], %142 {strides = array<i32>} : memref<1x12x256xf32, #tpu.memory_space<vmem>>, vector<1x12x256xf32>,
    return
  }
  func.func @transform_0(%arg0: i32) -> (i32, i32, i32) {
    %c0_i32 = arith.constant 0 : i32
    %c0_i32_0 = arith.constant 0 : i32
    %c0_i32_1 = arith.constant 0 : i32
    return %arg0, %c0_i32, %c0_i32_0 : i32, i32, i32
  }
  func.func @transform_1(%arg0: i32) -> (i32, i32) {
    %c0_i32 = arith.constant 0 : i32
    %c0_i32_0 = arith.constant 0 : i32
    %c0_i32_1 = arith.constant 0 : i32
    return %c0_i32, %c0_i32_0 : i32, i32
  }
  func.func @transform_2(%arg0: i32) -> (i32, i32) {
    %c0_i32 = arith.constant 0 : i32
    %c0_i32_0 = arith.constant 0 : i32
    %c0_i32_1 = arith.constant 0 : i32
    return %c0_i32, %c0_i32_0 : i32, i32
  }
  func.func @transform_3(%arg0: i32) -> (i32, i32) {
    %c0_i32 = arith.constant 0 : i32
    %c0_i32_0 = arith.constant 0 : i32
    %c0_i32_1 = arith.constant 0 : i32
    return %c0_i32, %c0_i32_0 : i32, i32
  }
  func.func @transform_4(%arg0: i32) -> (i32, i32) {
    %c0_i32 = arith.constant 0 : i32
    %c0_i32_0 = arith.constant 0 : i32
    %c0_i32_1 = arith.constant 0 : i32
    return %c0_i32, %c0_i32_0 : i32, i32
  }
  func.func @transform_5(%arg0: i32) -> (i32, i32) {
    %c0_i32 = arith.constant 0 : i32
    %c0_i32_0 = arith.constant 0 : i32
    %c0_i32_1 = arith.constant 0 : i32
    return %c0_i32, %c0_i32_0 : i32, i32
  }
  func.func @transform_6(%arg0: i32) -> (i32, i32) {
    %c0_i32 = arith.constant 0 : i32
    %c0_i32_0 = arith.constant 0 : i32
    %c0_i32_1 = arith.constant 0 : i32
    return %c0_i32, %c0_i32_0 : i32, i32
  }
  func.func @transform_7(%arg0: i32) -> (i32, i32, i32) {
    %c0_i32 = arith.constant 0 : i32
    %c0_i32_0 = arith.constant 0 : i32
    %c0_i32_1 = arith.constant 0 : i32
    return %arg0, %c0_i32, %c0_i32_0 : i32, i32, i32
  }
}

</mosaic_0001>

<bundles_post_ra>
// kernel: pelee_unit_forward.1
= control target key start
LH: loop header
LB: loop body
LE: loop exit
PB: predicated region body
PF: predicated region fallthrough
CT: control target
= control target key end

     0   :  { %s1355_s24 = smov 0   ;;  %s1739_s0 = inlined_call_operand.vmem [shape: f32[2,4,256], index: 0, kind: input, shape index: {}]   ;;  %s1740_s1 = inlined_call_operand.vmem [shape: bf16[16,4], index: 1, kind: input, shape index: {}]   ;;  %s1741_s2 = inlined_call_operand.vmem [shape: f32[16,1], index: 2, kind: input, shape index: {}]   ;;  %s1742_s3 = inlined_call_operand.vmem [shape: bf16[8,144], index: 3, kind: input, shape index: {}]   ;;  %s1743_s4 = inlined_call_operand.vmem [shape: f32[8,1], index: 4, kind: input, shape index: {}]   ;;  %s1744_s5 = inlined_call_operand.vmem [shape: bf16[4,36], index: 5, kind: input, shape index: {}]   ;;  %s1745_s6 = inlined_call_operand.vmem [shape: f32[4,1], index: 6, kind: input, shape index: {}]   ;;  %s1746_s7 = inlined_call_operand.vmem [shape: f32[2,12,256], index: 7, kind: output, shape index: {}]  }
   0x1 LB: > { %s1214_s25 = sadd.s32 4294967295, %s1302_s24   ;;  %p1218_p0 = scmp.ge.s32.totalorder %s1302_s24, 1  ;;  %s1302_s24 = sphi %s1355_s24, %s17_s24  }
   0x2   : > { %p237_p1 = scmp.lt.s32.totalorder %s1302_s24, 3 }
   0x4   : > { %p238_p2 = pnand %p1218_p0, %p237_p1 }
   0x5   : > { %p269_p3 = scmp.lt.s32.totalorder (!%p238_p2), %s1214_s25, 1  ;;  %v1304_v0 = vmov (!%p238_p2), 0   ;;  %v326_v1 = vld [vmem:[%s1741_s2] sm:$0xff] (!%p238_p2)  ;;  %v327_v2 = vld [vmem:[%s1741_s2 + $0x8] sm:$0xff] (!%p238_p2)  ;;  %vm1747_vm0 = vcmask (!%p238_p2), 1041408   ;;  %vm343_vm1 = vcmask (!%p238_p2), 31744   ;;  %v280_v24 = vlaneseq (!%p238_p2) }
   0x6   : > { %241 = sbr.rel (%p238_p2) target bundleno = 1316 (0x524), region = 48  ;;  %386 = vmatprep.mubr.bf16.mxu0 (!%p238_p2), %v1304_v0  ;;  %1254 = vset.pattern.permute.xlu0 (!%p238_p2), %v1304_v0  ;;  %v1257_v8 = vld [vmem:[%s1740_s1] sm:$0xff] (!%p238_p2)   ;;  %v1305_v9 = vmov (!%p238_p2), 0.0   ;;  %vm313_vm2 = vcmask (!%p238_p2), 277504   ;;  %s1306_s13 = smov (!%p238_p2), 17   ;;  %vm422_vm3 = vcmask (!%p238_p2), 1047688  }
   0x7   : > { %330 = vperm.xlu0 (!%p238_p2), %1254, %v326_v1   ;;  %1255 = vset.pattern.permute.xlu1 (!%p238_p2), %v1304_v0  ;;  %311 = vst [vmem:[#allocation2] sm:$0xff] (!%p238_p2), %v1305_v9  ;;  %315 = vst [vmem:[#allocation2 + $0x18] sm:$0xff] (!%p238_p2), %v1305_v9  ;;  %v1394_v25 = vand.u32 (!%p238_p2), 127, %v280_v24  ;;  %vm413_vm4 = vcmask (!%p238_p2), 138240   ;;  %s1307_s14 = smov (!%p238_p2), 127   ;;  %s1308_s15 = smov (!%p238_p2), 126  }
   0x8   : > { %314 = vst.msk [vmem:[#allocation2 + $0x10] sm:$0xff] (!%p238_p2), %vm313_vm2, %v1305_v9  ;;  %317 = vst.msk [vmem:[#allocation2 + $0x28] sm:$0xff] (!%p238_p2), %vm313_vm2, %v1305_v9  ;;  %s1309_s16 = smov (!%p238_p2), 112   ;;  %s1310_s17 = smov (!%p238_p2), 111   ;;  %v1522_v49 = vld [vmem:[%s1742_s3] sm:$0xff] (!%p238_p2)  ;;  %vm832_vm9 = vcmask (!%p238_p2), 130048  }
   0x9   : > { %v1397_v26 = vadd.s32 (!%p238_p2), 128, %v1394_v25  ;;  %v287_v29 = vand.u32 (!%p238_p2), 15, %v1394_v25  ;;  %s1311_s18 = smov (!%p238_p2), 110   ;;  %s1312_s19 = smov (!%p238_p2), 96   ;;  %v1227_v50 = vcombine.high (!%p238_p2), %v1522_v49, %v1522_v49  ;;  %v820_v51 = vld [vmem:[%s1743_s4] sm:$0xff] (!%p238_p2)  ;;  %vm1748_vm10 = vcmask (!%p238_p2), 1039360  }
   0xa   : > { %s1313_s20 = smov (!%p238_p2), 95   ;;  %s1314_s21 = smov (!%p238_p2), 94   ;;  %vm510_vm11 = vcmask (!%p238_p2), 1031168   ;;  %vm551_vm14 = vcmask (!%p238_p2), 916480   ;;  %vm592_vm15 = vcmask (!%p238_p2), 908288   ;;  %vm670_vm2 = vcmask (!%p238_p2), 785408  }
   0xb   : > { %335 = vperm.xlu0 (!%p238_p2), %1254, %v327_v2   ;;  %v294_v27 = vand.u32 (!%p238_p2), 15, %v1397_v26  ;;  %vm1411_vm6 = vcmp.ge.s32.totalorder (!%p238_p2), %v287_v29, 1  ;;  %1228 = vmatprep.mubr.msk.bf16.mxu1 (!%p238_p2), %vm832_vm9, %v1227_v50  ;;  %vm1541_vm12 = vcmp.le.s32.totalorder (!%p238_p2), %v287_v29, 14  ;;  %vm748_vm9 = vcmask (!%p238_p2), 769024  }
   0xc   : > { %vm1452_vm8 = vmpackc.low (!%p238_p2), %vm1411_vm6, %vm1411_vm6 }
   0xd   : > { %s1770_s25 = smov (!%p269_p3, %s1214_s25), 1  ;;  %vm1403_vm5 = vcmp.ge.s32.totalorder %v294_v27, 1  ;;  %vm1547_vm13 = vcmp.le.s32.totalorder %v294_v27, 14 }
   0xe   : > { %s1233_s30 = sshll.u32 %s1770_s25, 3  ;;  %vm1442_vm7 = vmpackc.low %vm1403_vm5, %vm1403_vm5  ;;  %s1234_s28 = sshll.u32 %s1770_s25, 5 }
   0xf   : > { %s273_s10 = scalar_lea.vmem %s1739_s0, %s1233_s30  ;;  %s1653_s8 = scalar_lea.vmem %s1746_s7, %s1234_s28 }
  0x10   : > { %v1375_v3 = vld [vmem:[%s273_s10] sm:$0xff] }
  0x11   : > { %v1379_v4 = vcombine.high %v1375_v3, %v1375_v3  ;;  %v322_v5 = vpack.c.bf16 %v1375_v3, %v1375_v3 }
  0x13   : > { %v323_v6 = vpack.c.bf16 %v1379_v4, %v1379_v4  ;;  %v349_v7 = vsel %vm1747_vm0, %v322_v5, 0 }
  0x15   : > { %1224 = vmatprep.subr.msk.bf16.mxu0 %vm1747_vm0, %v323_v6  ;;  %vm1597_vm0 = vmpackc.low %vm1547_vm13, %vm1547_vm13 }
  0x16   : > { %355 = vmatpush1.bf16.msra.mxu0 %v349_v7 }
  0x19   : > { %1225 = vmatmul.mubr.msk.bf16.vlgmr.msra.gmra.mrb[0].mxu0 %vm343_vm1, %v1257_v8  ;;  %vm629_vm1 = vcmask 900096  }
  0x1a   : > { %1139 = vmatprep.mubr.bf16.mxu0 %v1304_v0 }
  0x86   : > { %v331_v10 = vpop.permute.xlu0 %330 }
  0x8a   : > { %v336_v14 = vpop.permute.xlu0 %335 }
  0xec   : > { %v388_v11 = vpop.f32.mrb[0].mxu0 }
  0xed   : > { %v389_v12 = vadd.f32 %v388_v11, %v331_v10  ;;  %v390_v13 = vpop.f32.mrb[1].mxu0 }
  0xee   : > { %v392_v15 = vpop.f32.mrb[2].mxu0  ;;  %v391_v17 = vadd.f32 %v390_v13, %v331_v10 }
  0xef   : > { %v397_v16 = vmax.f32 %v389_v12, 0.0  ;;  %v393_v18 = vadd.f32 %v392_v15, %v336_v14  ;;  %v394_v19 = vpop.f32.mrb[3].mxu0 }
  0xf0   : > { %v398_v21 = vmax.f32 %v391_v17, 0.0  ;;  %v395_v22 = vadd.f32 %v394_v19, %v336_v14 }
  0xf1   : > { %v399_v20 = vmax.f32 %v393_v18, 0.0  ;;  %405 = vrot.lane.b32.xlu1 %v397_v16, %s1306_s13 }
  0xf2   : > { %v400_v23 = vmax.f32 %v395_v22, 0.0 }
  0xf3   : > { %409 = vrot.lane.b32.xlu0 %v399_v20, %s1306_s13 }
  0xf5   : > { %407 = vrot.lane.b32.xlu1 %v398_v21, %s1306_s13 }
  0xf9   : > { %411 = vrot.lane.b32.xlu1 %v400_v23, %s1306_s13 }
 0x163   : > { %v406_v28 = vpop.permute.xlu1 %405 }
 0x164   : > { %423 = vst.msk [vmem:[#allocation2] sm:$0xff] %vm422_vm3, %v406_v28 }
 0x165   : > { %v410_v30 = vpop.permute.xlu0 %409 }
 0x166   : > { %426 = vst.msk [vmem:[#allocation2 + $0x18] sm:$0xff] %vm422_vm3, %v410_v30  ;;  %vm711_vm3 = vcmask 777216  }
 0x167   : > { %v408_v32 = vpop.permute.xlu1 %407 }
 0x168   : > { %v414_v33 = vsel %vm413_vm4, %v406_v28, %v408_v32  ;;  %425 = vst.msk [vmem:[#allocation2 + $0x10] sm:$0xff] %vm413_vm4, %v408_v32 }
 0x169   : > { %424 = vst [vmem:[#allocation2 + $0x8] sm:$0xff] %v414_v33  ;;  %v438_v35 = vsel %vm1403_vm5, %v414_v33, 0.0 }
 0x16a   : > { %442 = vst [vmem:[#allocation3 + $0x8] sm:$0xff] %v438_v35 }
 0x16b   : > { %v1417_v36 = vld [vmem:[#allocation2] sm:$0xff]  ;;  %v412_v37 = vpop.permute.xlu1 %411 }
 0x16c   : > { %v437_v38 = vsel %vm1411_vm6, %v1417_v36, 0.0  ;;  %v1423_v39 = vsel %vm413_vm4, %v410_v30, %v412_v37  ;;  %428 = vst.msk [vmem:[#allocation2 + $0x28] sm:$0xff] %vm413_vm4, %v412_v37  ;;  %457 = vrot.lane.b32.xlu0 %v1417_v36, %s1307_s14 }
 0x16d   : > { %441 = vst [vmem:[#allocation3] sm:$0xff] %v437_v38  ;;  %v1428_v40 = vld [vmem:[#allocation2 + $0x18] sm:$0xff]  ;;  %v440_v41 = vsel %vm1403_vm5, %v1423_v39, 0.0  ;;  %v1261_v45 = vpack.c.bf16 %v1423_v39, %v414_v33 }
 0x16e   : > { %v439_v42 = vsel %vm1411_vm6, %v1428_v40, 0.0  ;;  %444 = vst [vmem:[#allocation3 + $0x18] sm:$0xff] %v440_v41  ;;  %v1264_v47 = vpack.c.bf16 %v1428_v40, %v1417_v36 }
 0x16f   : > { %443 = vst [vmem:[#allocation3 + $0x10] sm:$0xff] %v439_v42  ;;  %v447_v43 = vld [vmem:[#allocation2 + $0x10] sm:$0xff]  ;;  %1262 = vmatprep.subr.msk.bf16.mxu1 %vm1442_vm7, %v1261_v45 }
 0x170   : > { %498 = vrot.lane.b32.xlu0 %v1417_v36, %s1308_s15  ;;  %461 = vrot.lane.b32.xlu1 %v447_v43, %s1307_s14 }
 0x171   : > { %1265 = vmatpush1.bf16.msk.msra.mxu1 %vm1452_vm8, %v1264_v47 }
 0x173   : > { %v450_v48 = vld [vmem:[#allocation2 + $0x28] sm:$0xff] }
 0x174   : > { %539 = vrot.lane.b32.xlu0 %v1417_v36, %s1309_s16  ;;  %502 = vrot.lane.b32.xlu1 %v447_v43, %s1308_s15 }
 0x178   : > { %580 = vrot.lane.b32.xlu0 %v1417_v36, %s1310_s17  ;;  %543 = vrot.lane.b32.xlu1 %v447_v43, %s1309_s16 }
 0x17c   : > { %617 = vrot.lane.b32.xlu0 %v1417_v36, %s1311_s18  ;;  %584 = vrot.lane.b32.xlu1 %v447_v43, %s1310_s17 }
 0x180   : > { %658 = vrot.lane.b32.xlu0 %v1417_v36, %s1312_s19  ;;  %621 = vrot.lane.b32.xlu1 %v447_v43, %s1311_s18 }
 0x184   : > { %699 = vrot.lane.b32.xlu0 %v1417_v36, %s1313_s20  ;;  %662 = vrot.lane.b32.xlu1 %v447_v43, %s1312_s19 }
 0x188   : > { %703 = vrot.lane.b32.xlu1 %v447_v43, %s1313_s20  ;;  %459 = vrot.lane.b32.xlu0 %v414_v33, %s1307_s14 }
 0x18c   : > { %740 = vrot.lane.b32.xlu1 %v447_v43, %s1314_s21  ;;  %500 = vrot.lane.b32.xlu0 %v414_v33, %s1308_s15 }
 0x190   : > { %463 = vrot.lane.b32.xlu1 %v1428_v40, %s1307_s14  ;;  %541 = vrot.lane.b32.xlu0 %v414_v33, %s1309_s16 }
 0x194   : > { %504 = vrot.lane.b32.xlu1 %v1428_v40, %s1308_s15  ;;  %582 = vrot.lane.b32.xlu0 %v414_v33, %s1310_s17 }
 0x198   : > { %545 = vrot.lane.b32.xlu1 %v1428_v40, %s1309_s16  ;;  %619 = vrot.lane.b32.xlu0 %v414_v33, %s1311_s18 }
 0x19c   : > { %586 = vrot.lane.b32.xlu1 %v1428_v40, %s1310_s17  ;;  %660 = vrot.lane.b32.xlu0 %v414_v33, %s1312_s19 }
 0x1a0   : > { %623 = vrot.lane.b32.xlu1 %v1428_v40, %s1311_s18  ;;  %701 = vrot.lane.b32.xlu0 %v414_v33, %s1313_s20 }
 0x1a4   : > { %664 = vrot.lane.b32.xlu1 %v1428_v40, %s1312_s19  ;;  %738 = vrot.lane.b32.xlu0 %v414_v33, %s1314_s21 }
 0x1a8   : > { %705 = vrot.lane.b32.xlu1 %v1428_v40, %s1313_s20  ;;  %465 = vrot.lane.b32.xlu0 %v1423_v39, %s1307_s14 }
 0x1ac   : > { %467 = vrot.lane.b32.xlu1 %v450_v48, %s1307_s14  ;;  %506 = vrot.lane.b32.xlu0 %v1423_v39, %s1308_s15 }
 0x1b0   : > { %508 = vrot.lane.b32.xlu1 %v450_v48, %s1308_s15  ;;  %547 = vrot.lane.b32.xlu0 %v1423_v39, %s1309_s16 }
 0x1b4   : > { %549 = vrot.lane.b32.xlu1 %v450_v48, %s1309_s16  ;;  %588 = vrot.lane.b32.xlu0 %v1423_v39, %s1310_s17 }
 0x1b8   : > { %590 = vrot.lane.b32.xlu1 %v450_v48, %s1310_s17  ;;  %625 = vrot.lane.b32.xlu0 %v1423_v39, %s1311_s18 }
 0x1bc   : > { %627 = vrot.lane.b32.xlu1 %v450_v48, %s1311_s18  ;;  %666 = vrot.lane.b32.xlu0 %v1423_v39, %s1312_s19 }
 0x1c0   : > { %668 = vrot.lane.b32.xlu1 %v450_v48, %s1312_s19  ;;  %707 = vrot.lane.b32.xlu0 %v1423_v39, %s1313_s20 }
 0x1c4   : > { %709 = vrot.lane.b32.xlu1 %v450_v48, %s1313_s20  ;;  %744 = vrot.lane.b32.xlu0 %v1423_v39, %s1314_s21 }
 0x1c8   : > { %746 = vrot.lane.b32.xlu1 %v450_v48, %s1314_s21  ;;  %736 = vrot.lane.b32.xlu0 %v1417_v36, %s1314_s21 }
 0x1cc   : > { %742 = vrot.lane.b32.xlu1 %v1428_v40, %s1314_s21  ;;  %823 = vperm.xlu0 %1254, %v820_v51  }
 0x1de   : > { %v458_v52 = vpop.permute.xlu0 %457 }
 0x1e2   : > { %v499_v53 = vpop.permute.xlu0 %498  ;;  %v462_v54 = vpop.permute.xlu1 %461 }
 0x1e6   : > { %v540_v55 = vpop.permute.xlu0 %539  ;;  %v503_v56 = vpop.permute.xlu1 %502 }
 0x1ea   : > { %v581_v57 = vpop.permute.xlu0 %580  ;;  %v544_v58 = vpop.permute.xlu1 %543 }
 0x1ee   : > { %v618_v59 = vpop.permute.xlu0 %617  ;;  %v585_v60 = vpop.permute.xlu1 %584 }
 0x1f2   : > { %v659_v61 = vpop.permute.xlu0 %658  ;;  %v622_v62 = vpop.permute.xlu1 %621 }
 0x1f6   : > { %v700_v63 = vpop.permute.xlu0 %699  ;;  %v663_v0 = vpop.permute.xlu1 %662 }
 0x1fa   : > { %v460_v1 = vpop.permute.xlu0 %459  ;;  %v704_v2 = vpop.permute.xlu1 %703 }
 0x1fb   : > { %v470_v5 = vsel %vm1748_vm10, %v458_v52, %v460_v1  ;;  %v471_v6 = vsel %vm1748_vm10, %v460_v1, %v462_v54 }
 0x1fc   : > { %478 = vst [vmem:[#allocation3 + $0x20] sm:$0xff] %v470_v5  ;;  %479 = vst [vmem:[#allocation3 + $0x28] sm:$0xff] %v471_v6 }
 0x1fe   : > { %v501_v9 = vpop.permute.xlu0 %500  ;;  %v741_v10 = vpop.permute.xlu1 %740 }
 0x1ff   : > { %v511_v11 = vsel %vm510_vm11, %v499_v53, %v501_v9  ;;  %v512_v12 = vsel %vm510_vm11, %v501_v9, %v503_v56 }
 0x200   : > { %v519_v13 = vsel %vm1541_vm12, %v511_v11, 0.0  ;;  %v520_v14 = vsel %vm1547_vm13, %v512_v12, 0.0 }
 0x201   : > { %523 = vst [vmem:[#allocation3 + $0x40] sm:$0xff] %v519_v13  ;;  %524 = vst [vmem:[#allocation3 + $0x48] sm:$0xff] %v520_v14 }
 0x202   : > { %v542_v15 = vpop.permute.xlu0 %541  ;;  %v464_v16 = vpop.permute.xlu1 %463 }
 0x203   : > { %v552_v17 = vsel %vm551_vm14, %v540_v55, %v542_v15  ;;  %v553_v18 = vsel %vm551_vm14, %v542_v15, %v544_v58 }
 0x206   : > { %v583_v19 = vpop.permute.xlu0 %582  ;;  %v505_v20 = vpop.permute.xlu1 %504 }
 0x207   : > { %v1560_v21 = vsel %vm592_vm15, %v581_v57, %v583_v19  ;;  %v594_v22 = vsel %vm592_vm15, %v583_v19, %v585_v60 }
 0x20a   : > { %v620_v23 = vpop.permute.xlu0 %619  ;;  %v546_v24 = vpop.permute.xlu1 %545 }
 0x20b   : > { %v1564_v25 = vsel %vm629_vm1, %v618_v59, %v620_v23  ;;  %v1567_v26 = vsel %vm629_vm1, %v620_v23, %v622_v62 }
 0x20e   : > { %v661_v27 = vpop.permute.xlu0 %660  ;;  %v587_v28 = vpop.permute.xlu1 %586 }
 0x20f   : > { %v1570_v29 = vsel %vm670_vm2, %v659_v61, %v661_v27  ;;  %v1573_v30 = vsel %vm670_vm2, %v661_v27, %v663_v0 }
 0x212   : > { %v702_v32 = vpop.permute.xlu0 %701  ;;  %v624_v33 = vpop.permute.xlu1 %623 }
 0x213   : > { %v1576_v35 = vsel %vm711_vm3, %v700_v63, %v702_v32  ;;  %v1579_v36 = vsel %vm711_vm3, %v702_v32, %v704_v2 }
 0x216   : > { %v1581_v37 = vpop.permute.xlu0 %738  ;;  %v665_v38 = vpop.permute.xlu1 %664 }
 0x217   : > { %v1585_v39 = vsel %vm748_vm9, %v1581_v37, %v741_v10 }
 0x21a   : > { %v466_v40 = vpop.permute.xlu0 %465  ;;  %v706_v41 = vpop.permute.xlu1 %705 }
 0x21b   : > { %v472_v42 = vsel %vm1748_vm10, %v464_v16, %v466_v40 }
 0x21c   : > { %480 = vst [vmem:[#allocation3 + $0x30] sm:$0xff] %v472_v42  ;;  %v803_v51 = vpack.c.bf16 %v472_v42, %v470_v5 }
 0x21e   : > { %v507_v43 = vpop.permute.xlu0 %506  ;;  %v468_v45 = vpop.permute.xlu1 %467 }
 0x21f   : > { %v513_v47 = vsel %vm510_vm11, %v505_v20, %v507_v43  ;;  %v473_v48 = vsel %vm1748_vm10, %v466_v40, %v468_v45  ;;  %vm1606_vm10 = vmpackc.low %vm1541_vm12, %vm1541_vm12 }
 0x220   : > { %481 = vst [vmem:[#allocation3 + $0x38] sm:$0xff] %v473_v48  ;;  %v804_v50 = vpack.c.bf16 %v473_v48, %v471_v6  ;;  %v1270_v63 = vpack.c.bf16 %v513_v47, %v511_v11 }
 0x222   : > { %v548_v52 = vpop.permute.xlu0 %547  ;;  %v509_v53 = vpop.permute.xlu1 %508  ;;  %838 = vmatprep.subr.bf16.mxu1 %v804_v50 }
 0x223   : > { %v554_v54 = vsel %vm551_vm14, %v546_v24, %v548_v52  ;;  %v514_v55 = vsel %vm510_vm11, %v507_v43, %v509_v53  ;;  %839 = vmatpush1.bf16.msra.mxu1 %v803_v51 }
 0x224   : > { %v1267_v61 = vpack.c.bf16 %v514_v55, %v512_v12  ;;  %v1276_v9 = vpack.c.bf16 %v554_v54, %v552_v17 }
 0x226   : > { %v589_v56 = vpop.permute.xlu0 %588  ;;  %v550_v57 = vpop.permute.xlu1 %549  ;;  %1268 = vmatprep.subr.msk.bf16.mxu1 %vm1597_vm0, %v1267_v61 }
 0x227   : > { %v595_v58 = vsel %vm592_vm15, %v587_v28, %v589_v56  ;;  %v555_v59 = vsel %vm551_vm14, %v548_v52, %v550_v57  ;;  %1271 = vmatpush1.bf16.msk.msra.mxu1 %vm1606_vm10, %v1270_v63 }
 0x228   : > { %v1273_v6 = vpack.c.bf16 %v555_v59, %v553_v18  ;;  %v809_v13 = vpack.c.bf16 %v595_v58, %v1560_v21 }
 0x22a   : > { %v626_v0 = vpop.permute.xlu0 %625  ;;  %v591_v1 = vpop.permute.xlu1 %590  ;;  %1274 = vmatprep.subr.msk.bf16.mxu1 %vm1442_vm7, %v1273_v6 }
 0x22b   : > { %v632_v2 = vsel %vm629_vm1, %v624_v33, %v626_v0  ;;  %v596_v5 = vsel %vm592_vm15, %v589_v56, %v591_v1  ;;  %1277 = vmatpush1.bf16.msk.msra.mxu1 %vm1452_vm8, %v1276_v9 }
 0x22c   : > { %v810_v10 = vpack.c.bf16 %v596_v5, %v594_v22  ;;  %v1282_v22 = vpack.c.bf16 %v632_v2, %v1564_v25 }
 0x22e   : > { %v667_v12 = vpop.permute.xlu0 %666  ;;  %v628_v11 = vpop.permute.xlu1 %627  ;;  %844 = vmatprep.subr.bf16.mxu1 %v810_v10 }
 0x22f   : > { %v673_v14 = vsel %vm670_vm2, %v665_v38, %v667_v12  ;;  %v633_v15 = vsel %vm629_vm1, %v626_v0, %v628_v11  ;;  %845 = vmatpush1.bf16.msra.mxu1 %v809_v13 }
 0x230   : > { %v1279_v20 = vpack.c.bf16 %v633_v15, %v1567_v26  ;;  %v1288_v28 = vpack.c.bf16 %v673_v14, %v1570_v29 }
 0x232   : > { %v708_v16 = vpop.permute.xlu0 %707  ;;  %v669_v18 = vpop.permute.xlu1 %668  ;;  %1280 = vmatprep.subr.msk.bf16.mxu1 %vm1597_vm0, %v1279_v20 }
 0x233   : > { %v714_v19 = vsel %vm711_vm3, %v706_v41, %v708_v16  ;;  %v674_v17 = vsel %vm670_vm2, %v667_v12, %v669_v18  ;;  %1283 = vmatpush1.bf16.msk.msra.mxu1 %vm1606_vm10, %v1282_v22 }
 0x234   : > { %v1285_v27 = vpack.c.bf16 %v674_v17, %v1573_v30  ;;  %v815_v33 = vpack.c.bf16 %v714_v19, %v1576_v35 }
 0x236   : > { %v745_v21 = vpop.permute.xlu0 %744  ;;  %v710_v23 = vpop.permute.xlu1 %709  ;;  %1286 = vmatprep.subr.msk.bf16.mxu1 %vm1442_vm7, %v1285_v27  ;;  %vm1152_vm7 = vcmask 1043456  }
 0x237   : > { %v715_v24 = vsel %vm711_vm3, %v708_v16, %v710_v23  ;;  %1289 = vmatpush1.bf16.msk.msra.mxu1 %vm1452_vm8, %v1288_v28  ;;  %vm894_vm8 = vcmask 134144  }
 0x238   : > { %v816_v26 = vpack.c.bf16 %v715_v24, %v1579_v36  ;;  %v1226_v36 = vcombine.low %v1522_v49, %v1522_v49 }
 0x23a   : > { %v737_v25 = vpop.permute.xlu0 %736  ;;  %v747_v32 = vpop.permute.xlu1 %746  ;;  %850 = vmatprep.subr.bf16.mxu1 %v816_v26 }
 0x23b   : > { %v749_v38 = vsel %vm748_vm9, %v737_v25, %v1581_v37  ;;  %v752_v30 = vsel %vm748_vm9, %v745_v21, %v747_v32  ;;  %851 = vmatpush1.bf16.msra.mxu1 %v815_v33  ;;  %v1091_v25 = vld [vmem:[%s1745_s6] sm:$0xf] }
 0x23c   : > { %v1291_v46 = vpack.c.bf16 %v752_v30, %v1585_v39 }
 0x23e   : > { %v743_v44 = vpop.permute.xlu1 %742  ;;  %1292 = vmatprep.subr.msk.bf16.mxu1 %vm1597_vm0, %v1291_v46  ;;  %vm891_vm0 = vcmask 1043592  }
 0x23f   : > { %v751_v29 = vsel %vm748_vm9, %v743_v44, %v745_v21 }
 0x240   : > { %v1294_v40 = vpack.c.bf16 %v751_v29, %v749_v38 }
 0x242   : > { %1295 = vmatpush1.bf16.msk.msra.mxu1 %vm1606_vm10, %v1294_v40 }
 0x245   : > { %869 = vmatmul.mubr.bf16.vlgmr.msra.gmra.mrb[0].mxu1 %v1226_v36 }
 0x24b   : > { %v824_v35 = vpop.permute.xlu0 %823 }
 0x318   : > { %v870_v37 = vpop.f32.mrb[0].mxu1 }
 0x319   : > { %v871_v41 = vadd.f32 %v870_v37, %v824_v35  ;;  %v872_v42 = vpop.f32.mrb[1].mxu1 }
 0x31a   : > { %v873_v43 = vadd.f32 %v872_v42, %v824_v35  ;;  %v874_v45 = vpop.f32.mrb[2].mxu1 }
 0x31b   : > { %v877_v47 = vmax.f32 %v871_v41, 0.0  ;;  %v875_v39 = vpop.f32.mrb[3].mxu1 }
 0x31c   : > { %v878_v48 = vmax.f32 %v873_v43, 0.0 }
 0x31d   : > { %v881_v49 = vrot.slane %v877_v47, 4 }
 0x31e   : > { %v882_v50 = vrot.slane %v878_v48, 4 }
 0x31f   : > { %v1153_v51 = vsel %vm1152_vm7, %v1375_v3, %v881_v49  ;;  %883 = vrot.lane.b32.xlu1 %v881_v49, %s1306_s13 }
 0x320   : > { %1155 = vst [vmem:[%s1653_s8] sm:$0xff] %v1153_v51  ;;  %v1154_v52 = vsel %vm1152_vm7, %v1379_v4, %v882_v50  ;;  %885 = vrot.lane.b32.xlu0 %v882_v50, %s1306_s13 }
 0x321   : > { %1156 = vst [vmem:[%s1653_s8 + $0x8] sm:$0xff] %v1154_v52 }
 0x391   : > { %v884_v53 = vpop.permute.xlu1 %883 }
 0x392   : > { %v886_v54 = vpop.permute.xlu0 %885  ;;  %892 = vst.msk [vmem:[#allocation2] sm:$0xf] %vm891_vm0, %v884_v53 }
 0x393   : > { %v887_v55 = vsel %vm413_vm4, %v884_v53, %v886_v54  ;;  %895 = vst.msk [vmem:[#allocation2 + $0x10] sm:$0xf] %vm894_vm8, %v886_v54  ;;  %vm1765_vm4 = vcmask 1039360  }
 0x394   : > { %893 = vst [vmem:[#allocation2 + $0x8] sm:$0xf] %v887_v55 }
 0x399   : > { %v943_v56 = vld [vmem:[#allocation2] sm:$0xf] }
 0x39a   : > { %v923_v57 = vld [vmem:[#allocation2] sm:$0xf]  ;;  %949 = vrot.lane.b32.xlu1 %v943_v56, %s1309_s16  ;;  %v925_v58 = vld [vmem:[#allocation2 + $0x10] sm:$0xf] }
 0x39b   : > { %929 = vrot.lane.b32.xlu0 %v923_v57, %s1308_s15  ;;  %v1013_v3 = vld [vmem:[#allocation2] sm:$0xf]  ;;  %v897_v60 = vld [vmem:[#allocation2 + $0x8] sm:$0xf]  ;;  %v989_v0 = vld [vmem:[#allocation2 + $0x10] sm:$0xf] }
 0x39c   : > { %v987_v4 = vld [vmem:[#allocation2] sm:$0xf]  ;;  %v899_v61 = vsel %vm1403_vm5, %v897_v60, 0.0  ;;  %v945_v2 = vld [vmem:[#allocation2 + $0x10] sm:$0xf] }
 0x39d   : > { %v969_v59 = vld [vmem:[#allocation2] sm:$0xf]  ;;  %901 = vst [vmem:[#allocation3 + $0x8] sm:$0xf] %v899_v61  ;;  %v944_v5 = vld [vmem:[#allocation2 + $0x8] sm:$0xf] }
 0x39e   : > { %1019 = vrot.lane.b32.xlu1 %v1013_v3, %s1312_s19  ;;  %v896_v62 = vld [vmem:[#allocation2] sm:$0xf]  ;;  %v1015_v10 = vld [vmem:[#allocation2 + $0x10] sm:$0xf]  ;;  %v1014_v11 = vld [vmem:[#allocation2 + $0x8] sm:$0xf] }
 0x39f   : > { %993 = vrot.lane.b32.xlu0 %v987_v4, %s1311_s18  ;;  %v898_v63 = vsel %vm1411_vm6, %v896_v62, 0.0  ;;  %v1054_v1 = vld [vmem:[#allocation2] sm:$0xf]  ;;  %v971_v12 = vld [vmem:[#allocation2 + $0x10] sm:$0xf] }
 0x3a0   : > { %900 = vst [vmem:[#allocation3] sm:$0xf] %v898_v63  ;;  %v902_v6 = vld [vmem:[#allocation2] sm:$0xf]  ;;  %v970_v13 = vld [vmem:[#allocation2 + $0x8] sm:$0xf] }
 0x3a1   : > { %v908_v9 = vrot.slane %v902_v6, 4  ;;  %v924_v14 = vld [vmem:[#allocation2 + $0x8] sm:$0xf]  ;;  %v1033_v15 = vld [vmem:[#allocation2] sm:$0xf] }
 0x3a2   : > { %933 = vrot.lane.b32.xlu1 %v925_v58, %s1308_s15  ;;  %v1039_v16 = vrot.slane %v1033_v15, 4  ;;  %v988_v18 = vld [vmem:[#allocation2 + $0x8] sm:$0xf]  ;;  %v904_v19 = vld [vmem:[#allocation2 + $0x10] sm:$0xf] }
 0x3a3   : > { %975 = vrot.lane.b32.xlu0 %v969_v59, %s1310_s17  ;;  %v903_v17 = vld [vmem:[#allocation2 + $0x8] sm:$0xf]  ;;  %v910_v20 = vrot.slane %v904_v19, 4  ;;  %v1035_v21 = vld [vmem:[#allocation2 + $0x10] sm:$0xf] }
 0x3a4   : > { %v909_v22 = vrot.slane %v903_v17, 4  ;;  %v1034_v23 = vld [vmem:[#allocation2 + $0x8] sm:$0xf]  ;;  %v1041_v24 = vrot.slane %v1035_v21, 4  ;;  %v1056_v26 = vld [vmem:[#allocation2 + $0x10] sm:$0xf] }
 0x3a5   : > { %v1040_v27 = vrot.slane %v1034_v23, 4  ;;  %v1055_v28 = vld [vmem:[#allocation2 + $0x8] sm:$0xf] }
 0x3a6   : > { %997 = vrot.lane.b32.xlu1 %v989_v0, %s1311_s18 }
 0x3a7   : > { %1060 = vrot.lane.b32.xlu0 %v1054_v1, %s1314_s21 }
 0x3aa   : > { %951 = vrot.lane.b32.xlu1 %v944_v5, %s1309_s16 }
 0x3ab   : > { %953 = vrot.lane.b32.xlu0 %v945_v2, %s1309_s16 }
 0x3ae   : > { %911 = vrot.lane.b32.xlu1 %v908_v9, %s1307_s14 }
 0x3af   : > { %1023 = vrot.lane.b32.xlu0 %v1015_v10, %s1312_s19 }
 0x3b2   : > { %1021 = vrot.lane.b32.xlu1 %v1014_v11, %s1312_s19 }
 0x3b3   : > { %979 = vrot.lane.b32.xlu0 %v971_v12, %s1310_s17 }
 0x3b6   : > { %977 = vrot.lane.b32.xlu1 %v970_v13, %s1310_s17 }
 0x3b7   : > { %931 = vrot.lane.b32.xlu0 %v924_v14, %s1308_s15 }
 0x3ba   : > { %1042 = vrot.lane.b32.xlu1 %v1039_v16, %s1313_s20 }
 0x3bb   : > { %995 = vrot.lane.b32.xlu0 %v988_v18, %s1311_s18 }
 0x3be   : > { %915 = vrot.lane.b32.xlu1 %v910_v20, %s1307_s14 }
 0x3bf   : > { %913 = vrot.lane.b32.xlu0 %v909_v22, %s1307_s14 }
 0x3c2   : > { %1046 = vrot.lane.b32.xlu1 %v1041_v24, %s1313_s20 }
 0x3c3   : > { %1044 = vrot.lane.b32.xlu0 %v1040_v27, %s1313_s20 }
 0x3c6   : > { %1062 = vrot.lane.b32.xlu1 %v1055_v28, %s1314_s21 }
 0x3c7   : > { %1064 = vrot.lane.b32.xlu0 %v1056_v26, %s1314_s21 }
 0x3ca   : > { %1094 = vperm.xlu1 %1255, %v1091_v25  }
 0x40c   : > { %v950_v32 = vpop.permute.xlu1 %949 }
 0x40d   : > { %v930_v33 = vpop.permute.xlu0 %929 }
 0x410   : > { %v1020_v38 = vpop.permute.xlu1 %1019 }
 0x411   : > { %v994_v30 = vpop.permute.xlu0 %993 }
 0x414   : > { %v934_v44 = vpop.permute.xlu1 %933 }
 0x415   : > { %v976_v29 = vpop.permute.xlu0 %975 }
 0x418   : > { %v998_v46 = vpop.permute.xlu1 %997 }
 0x419   : > { %v1061_v36 = vpop.permute.xlu0 %1060 }
 0x41c   : > { %v952_v35 = vpop.permute.xlu1 %951 }
 0x41d   : > { %v954_v40 = vpop.permute.xlu0 %953  ;;  %v955_v37 = vsel %vm551_vm14, %v950_v32, %v952_v35 }
 0x41e   : > { %v956_v41 = vsel %vm551_vm14, %v952_v35, %v954_v40  ;;  %v959_v42 = vsel %vm1411_vm6, %v955_v37, 0.0 }
 0x41f   : > { %v960_v43 = vsel %vm1403_vm5, %v956_v41, 0.0  ;;  %v963_v45 = vrot.slane %v959_v42, 4 }
 0x420   : > { %v964_v47 = vrot.slane %v960_v43, 4  ;;  %v912_v48 = vpop.permute.xlu1 %911 }
 0x421   : > { %v1024_v39 = vpop.permute.xlu0 %1023  ;;  %967 = vst [vmem:[#allocation3 + $0x10] sm:$0xf0] %v963_v45 }
 0x422   : > { %968 = vst [vmem:[#allocation3 + $0x18] sm:$0xf0] %v964_v47 }
 0x424   : > { %v1022_v50 = vpop.permute.xlu1 %1021 }
 0x425   : > { %v980_v49 = vpop.permute.xlu0 %979  ;;  %v1025_v51 = vsel %vm670_vm2, %v1020_v38, %v1022_v50  ;;  %v1026_v52 = vsel %vm670_vm2, %v1022_v50, %v1024_v39 }
 0x426   : > { %v1029_v53 = vsel %vm1411_vm6, %v1025_v51, 0.0  ;;  %v1030_v54 = vsel %vm1403_vm5, %v1026_v52, 0.0  ;;  %vm1766_vm5 = vmmov %vm1765_vm4  ;;  %vm1767_vm6 = vcmask 1041408  }
 0x427   : > { %1031 = vst [vmem:[#allocation3 + $0x30] sm:$0xf] %v1029_v53  ;;  %1032 = vst [vmem:[#allocation3 + $0x38] sm:$0xf] %v1030_v54 }
 0x428   : > { %v978_v55 = vpop.permute.xlu1 %977  ;;  %vm1768_vm10 = vmmov %vm1767_vm6 }
 0x429   : > { %v932_v56 = vpop.permute.xlu0 %931  ;;  %v981_v57 = vsel %vm592_vm15, %v976_v29, %v978_v55  ;;  %v982_v3 = vsel %vm592_vm15, %v978_v55, %v980_v49 }
 0x42a   : > { %v935_v4 = vsel %vm510_vm11, %v930_v33, %v932_v56  ;;  %v936_v58 = vsel %vm510_vm11, %v932_v56, %v934_v44  ;;  %985 = vst [vmem:[#allocation3 + $0x20] sm:$0xf] %v981_v57  ;;  %986 = vst [vmem:[#allocation3 + $0x28] sm:$0xf] %v982_v3  ;;  %vm1097_vm11 = vcmask 293888  }
 0x42b   : > { %v939_v34 = vsel %vm1541_vm12, %v935_v4, 0.0  ;;  %v940_v31 = vsel %vm1547_vm13, %v936_v58, 0.0 }
 0x42c   : > { %941 = vst [vmem:[#allocation3 + $0x10] sm:$0xf] %v939_v34  ;;  %942 = vst [vmem:[#allocation3 + $0x18] sm:$0xf] %v940_v31  ;;  %v1043_v59 = vpop.permute.xlu1 %1042 }
 0x42d   : > { %v996_v60 = vpop.permute.xlu0 %995 }
 0x42e   : > { %v999_v61 = vsel %vm629_vm1, %v994_v30, %v996_v60  ;;  %v1000_v62 = vsel %vm629_vm1, %v996_v60, %v998_v46 }
 0x42f   : > { %v1003_v63 = vsel %vm1541_vm12, %v999_v61, 0.0  ;;  %v1004_v0 = vsel %vm1547_vm13, %v1000_v62, 0.0 }
 0x430   : > { %v1007_v1 = vrot.slane %v1003_v63, 4  ;;  %v1008_v2 = vrot.slane %v1004_v0, 4  ;;  %v916_v5 = vpop.permute.xlu1 %915 }
 0x431   : > { %v914_v6 = vpop.permute.xlu0 %913 }
 0x432   : > { %1011 = vst [vmem:[#allocation3 + $0x20] sm:$0xf0] %v1007_v1  ;;  %1012 = vst [vmem:[#allocation3 + $0x28] sm:$0xf0] %v1008_v2  ;;  %v917_v9 = vsel %vm1765_vm4, %v912_v48, %v914_v6  ;;  %v918_v10 = vsel %vm1766_vm5, %v914_v6, %v916_v5 }
 0x433   : > { %921 = vst [vmem:[#allocation3] sm:$0xf0] %v917_v9  ;;  %922 = vst [vmem:[#allocation3 + $0x8] sm:$0xf0] %v918_v10  ;;  %v1077_v18 = vld [vmem:[#allocation3 + $0x18] sm:$0xff]  ;;  %v1076_v21 = vld [vmem:[#allocation3 + $0x10] sm:$0xff] }
 0x434   : > { %v1047_v12 = vpop.permute.xlu1 %1046 }
 0x435   : > { %v1045_v11 = vpop.permute.xlu0 %1044 }
 0x436   : > { %v1048_v13 = vsel %vm711_vm3, %v1043_v59, %v1045_v11  ;;  %v1049_v14 = vsel %vm711_vm3, %v1045_v11, %v1047_v12 }
 0x437   : > { %1052 = vst [vmem:[#allocation3 + $0x30] sm:$0xf0] %v1048_v13  ;;  %1053 = vst [vmem:[#allocation3 + $0x38] sm:$0xf0] %v1049_v14 }
 0x438   : > { %v1063_v15 = vpop.permute.xlu1 %1062 }
 0x439   : > { %v1065_v16 = vpop.permute.xlu0 %1064  ;;  %v1066_v19 = vsel %vm748_vm9, %v1061_v36, %v1063_v15  ;;  %v1079_v26 = vld [vmem:[#allocation3 + $0x28] sm:$0xff]  ;;  %v1078_v32 = vld [vmem:[#allocation3 + $0x20] sm:$0xff]  ;;  %v1090_v36 = vld [vmem:[%s1744_s5] sm:$0x3] }
 0x43a   : > { %v1067_v17 = vsel %vm748_vm9, %v1063_v15, %v1065_v16  ;;  %v1075_v20 = vld [vmem:[#allocation3 + $0x8] sm:$0xff]  ;;  %v1074_v22 = vld [vmem:[#allocation3] sm:$0xff]  ;;  %v1070_v23 = vsel %vm1541_vm12, %v1066_v19, 0.0 }
 0x43b   : > { %v1071_v24 = vsel %vm1547_vm13, %v1067_v17, 0.0  ;;  %v1085_v27 = vpack.c.bf16 %v1077_v18, %v1075_v20  ;;  %v1084_v28 = vpack.c.bf16 %v1076_v21, %v1074_v22  ;;  %1072 = vst [vmem:[#allocation3 + $0x40] sm:$0xf] %v1070_v23 }
 0x43c   : > { %1073 = vst [vmem:[#allocation3 + $0x48] sm:$0xf] %v1071_v24 }
 0x43d   : > { %1107 = vmatprep.subr.bf16.mxu0 %v1085_v27 }
 0x43e   : > { %1108 = vmatpush1.bf16.msra.mxu0 %v1084_v28  ;;  %v1081_v25 = vld [vmem:[#allocation3 + $0x38] sm:$0xff]  ;;  %v1080_v33 = vld [vmem:[#allocation3 + $0x30] sm:$0xff] }
 0x43f   : > { %v1087_v38 = vpack.c.bf16 %v1081_v25, %v1079_v26  ;;  %v1086_v30 = vpack.c.bf16 %v1080_v33, %v1078_v32 }
 0x441   : > { %1109 = vmatprep.subr.bf16.mxu0 %v1087_v38 }
 0x442   : > { %1110 = vmatpush1.bf16.msra.mxu0 %v1086_v30  ;;  %v1082_v7 = vld [vmem:[#allocation3 + $0x40] sm:$0xf] }
 0x443   : > { %v1083_v44 = vld [vmem:[#allocation3 + $0x48] sm:$0xf]  ;;  %v1088_v46 = vpack.c.bf16 %v1082_v7, %v1082_v7 }
 0x444   : > { %v1089_v29 = vpack.c.bf16 %v1083_v44, %v1083_v44 }
 0x445   : > { %v1102_v8 = vsel %vm1768_vm10, %v1088_v46, 0 }
 0x446   : > { %1229 = vmatprep.subr.msk.bf16.mxu0 %vm1767_vm6, %v1089_v29 }
 0x447   : > { %1112 = vmatpush1.bf16.msra.mxu0 %v1102_v8 }
 0x449   : > { %v1095_v40 = vpop.permute.xlu1 %1094 }
 0x44a   : > { %1230 = vmatmul.mubr.msk.bf16.vlgmr.msra.gmra.mrb[4].mxu0 %vm1097_vm11, %v1090_v36 }
 0x51d   : > { %v1141_v35 = vpop.f32.mrb[4].mxu0 }
 0x51e   : > { %v1142_v37 = vadd.f32 %v1141_v35, %v1095_v40  ;;  %v1143_v41 = vpop.f32.mrb[5].mxu0 }
 0x51f   : > { %v1144_v42 = vadd.f32 %v1143_v41, %v1095_v40  ;;  %v1145_v43 = vpop.f32.mrb[6].mxu0 }
 0x520   : > { %v1148_v45 = vmax.f32 %v1142_v37, 0.0  ;;  %v1146_v47 = vpop.f32.mrb[7].mxu0 }
 0x521   : > { %v1149_v39 = vmax.f32 %v1144_v42, 0.0 }
 0x522   : > { %1157 = vst [vmem:[%s1653_s8 + $0x10] sm:$0xf] %v1148_v45 }
 0x523   : > { %1158 = vst [vmem:[%s1653_s8 + $0x18] sm:$0xf] %v1149_v39 }
 0x524 PF: > { %s17_s24 = sadd.s32 1, %s1302_s24  }
 0x525   : > { %p14_p4 = scmp.ge.s32.totalorder %s17_s24, 4  }
 0x527   :  { %16 = sbr.rel (!%p14_p4) target bundleno = 1 (0x1), region = 78 }

</bundles_post_ra>
